<compile_context>
chip_gen: v7x
topology: tpu7x:2x2x1
jax: 0.10.0
libtpu: 0.0.40
codegen_flags: <defaults>
</compile_context>

<pallas_src>
import functools

import jax
import jax.numpy as jnp
from jax.experimental import pallas as pl
from jax.experimental.pallas import tpu as pltpu


def _lstm_kernel(x_ref, wih_ref, whh_ref, b_ref, wfc_ref, bfc_ref,
                 out_ref, *, seq_len, batch, hidden_size):
    """Single kernel invocation: hoisted input projection + unrolled T-step LSTM."""
    B = batch
    H = hidden_size
    PREC = jax.lax.Precision.DEFAULT   # pin to single-pass bf16 MXU, f32 accumulate

    # ---- Hoisted input projection: one MXU call, bias folded in, kept as values --
    # x_ref is time-major-flattened (T*B, D); xproj is (T*B, 4H) = 8 vregs, no VMEM
    # scratch round-trip.
    xproj = (
        jnp.dot(x_ref[...], wih_ref[...],
                precision=PREC, preferred_element_type=jnp.float32)
        + b_ref[...]
    )

    # Loop-invariant recurrent weight, loaded once (not per step).
    whh = whh_ref[...]                                     # (H, 4H)

    h = jnp.zeros((B, H), jnp.float32)
    c = jnp.zeros((B, H), jnp.float32)

    # Fully-unrolled static recurrence: only h @ W_hh^T sits on the serial path.
    for t in range(seq_len):
        g_x = xproj[t * B:(t + 1) * B, :]                  # static, sublane-aligned
        gates = g_x + jnp.dot(h, whh, precision=PREC,
                              preferred_element_type=jnp.float32)   # (B, 4H)

        # Two full-width EUP passes over the packed (B, 4H) tile, then slice.
        sig = jax.nn.sigmoid(gates)
        th = jnp.tanh(gates)
        i_g = sig[:, 0 * H:1 * H]
        f_g = sig[:, 1 * H:2 * H]
        g_g = th[:, 2 * H:3 * H]
        o_g = sig[:, 3 * H:4 * H]

        c = f_g * c + i_g * g_g
        h = o_g * jnp.tanh(c)

    # Dropout is identity at inference; Linear(H -> 12) + sigmoid (one-time store).
    logits = (jnp.dot(h, wfc_ref[...], precision=PREC,
                      preferred_element_type=jnp.float32)
              + bfc_ref[...])
    out_ref[...] = jax.nn.sigmoid(logits)


def lstm_model_forward(x, params):
    """x: [B, T, D] float32 (PyTorch batch_first layout). Returns [B, 12]."""
    B, T, D = x.shape
    H = params["whh_t"].shape[0]
    n_out = params["wfc_t"].shape[1]

    # Sublane alignment: pad batch up to a multiple of 8 (f32 sublane); no-op at B=8.
    B_pad = ((B + 7) // 8) * 8
    if B_pad != B:
        x = jnp.pad(x, ((0, B_pad - B), (0, 0), (0, 0)))

    # Time-major flatten so rows [t*B_pad : (t+1)*B_pad] of x_flat are time step t
    # (makes the hoisted projection's per-step slice a plain aligned row range).
    x_flat = jnp.transpose(x, (1, 0, 2)).reshape(T * B_pad, D)

    kernel = functools.partial(_lstm_kernel, seq_len=T, batch=B_pad, hidden_size=H)

    vmem_spec = pl.BlockSpec(memory_space=pltpu.MemorySpace.VMEM)
    out = pl.pallas_call(
        kernel,
        out_shape=jax.ShapeDtypeStruct((B_pad, n_out), jnp.float32),
        in_specs=[vmem_spec] * 6,          # everything resident, no grid pipeline
        out_specs=vmem_spec,
    )(x_flat, params["wih_t"], params["whh_t"], params["b"],
      params["wfc_t"], params["bfc"])
    return out[:B]


def init_params(key, input_size, hidden_size, n_out=12):
    """Deterministic uniform(-k, k) init, mirroring PyTorch default shapes."""
    k = 1.0 / jnp.sqrt(hidden_size)
    ks = jax.random.split(key, 6)
    w_ih = jax.random.uniform(ks[0], (4 * hidden_size, input_size), jnp.float32, -k, k)
    w_hh = jax.random.uniform(ks[1], (4 * hidden_size, hidden_size), jnp.float32, -k, k)
    b_ih = jax.random.uniform(ks[2], (4 * hidden_size,), jnp.float32, -k, k)
    b_hh = jax.random.uniform(ks[3], (4 * hidden_size,), jnp.float32, -k, k)
    w_fc = jax.random.uniform(ks[4], (n_out, hidden_size), jnp.float32, -k, k)
    b_fc = jax.random.uniform(ks[5], (n_out,), jnp.float32, -k, k)
    return {
        "wih_t": w_ih.T,                              # [D, 4H]
        "whh_t": w_hh.T,                              # [H, 4H]
        "b": (b_ih + b_hh).reshape(1, 4 * hidden_size),
        "wfc_t": w_fc.T,                              # [H, 12]
        "bfc": b_fc.reshape(1, n_out),
    }


def _reference_forward(x, params):
    """Pure-JAX reference matching PyTorch nn.LSTM semantics (eval mode)."""
    B, T, D = x.shape
    H = params["whh_t"].shape[0]
    h = jnp.zeros((B, H), jnp.float32)
    c = jnp.zeros((B, H), jnp.float32)
    for t in range(T):
        gates = x[:, t, :] @ params["wih_t"] + h @ params["whh_t"] + params["b"]
        i = jax.nn.sigmoid(gates[:, 0 * H:1 * H])
        f = jax.nn.sigmoid(gates[:, 1 * H:2 * H])
        g = jnp.tanh(gates[:, 2 * H:3 * H])
        o = jax.nn.sigmoid(gates[:, 3 * H:4 * H])
        c = f * c + i * g
        h = o * jnp.tanh(c)
    return jax.nn.sigmoid(h @ params["wfc_t"] + params["bfc"])


if __name__ == "__main__":
    B, T, D, H = 8, 8, 16, 32

    key = jax.random.PRNGKey(0)
    k_x, k_p = jax.random.split(key)
    x = jax.random.normal(k_x, (B, T, D), dtype=jnp.float32)
    params = init_params(k_p, D, H)

    out = lstm_model_forward(x, params)
    out = jax.block_until_ready(out)

    ref = _reference_forward(x, params)
    assert out.shape == (B, 12)
    assert jnp.allclose(out, ref, atol=1e-5, rtol=1e-5), "mismatch vs JAX reference"

    print("KERNEL_OK")
</pallas_src>

<mosaic_0001>
module attributes {stable_mosaic.version = 11 : i64} {
  func.func @_lstm_kernel(%arg0: memref<64x16xf32, #tpu.memory_space<vmem>>, %arg1: memref<16x128xf32, #tpu.memory_space<vmem>>, %arg2: memref<32x128xf32, #tpu.memory_space<vmem>>, %arg3: memref<1x128xf32, #tpu.memory_space<vmem>>, %arg4: memref<32x12xf32, #tpu.memory_space<vmem>>, %arg5: memref<1x12xf32, #tpu.memory_space<vmem>>, %arg6: memref<8x12xf32, #tpu.memory_space<vmem>>) attributes {dimension_semantics = [], scalar_prefetch = 0 : i64, scratch_operands = 0 : i64, tpu.core_type = #tpu.core_type<tc>} {
    %c0 = arith.constant 0 : index
    %c0_0 = arith.constant 0 : index
    %0 = vector.load %arg0[%c0, %c0_0] : memref<64x16xf32, #tpu.memory_space<vmem>>, vector<64x16xf32>
    %c0_1 = arith.constant 0 : index
    %c0_2 = arith.constant 0 : index
    %1 = vector.load %arg1[%c0_1, %c0_2] : memref<16x128xf32, #tpu.memory_space<vmem>>, vector<16x128xf32>
    %cst = arith.constant dense<0.000000e+00> : vector<64x128xf32>
    %2 = tpu.matmul %0, %1, %cst {dimension_numbers = #tpu.dot_dimension_numbers<[1], [0], [0], [1], [0, 0, 1, 1], [], []>} : vector<64x16xf32>, vector<16x128xf32>, vector<64x128xf32> -> vector<64x128xf32>
    %c0_3 = arith.constant 0 : index
    %c0_4 = arith.constant 0 : index
    %3 = vector.load %arg3[%c0_3, %c0_4] : memref<1x128xf32, #tpu.memory_space<vmem>>, vector<1x128xf32>
    %4 = vector.broadcast %3 : vector<1x128xf32> to vector<64x128xf32>
    %5 = arith.addf %2, %4 : vector<64x128xf32>
    %c0_5 = arith.constant 0 : index
    %c0_6 = arith.constant 0 : index
    %6 = vector.load %arg2[%c0_5, %c0_6] : memref<32x128xf32, #tpu.memory_space<vmem>>, vector<32x128xf32>
    %cst_7 = arith.constant 0.000000e+00 : f32
    %7 = vector.broadcast %cst_7 : f32 to vector<8x32xf32>
    %cst_8 = arith.constant 0.000000e+00 : f32
    %8 = vector.broadcast %cst_8 : f32 to vector<8x32xf32>
    %9 = vector.extract_strided_slice %5 {offsets = [0, 0], sizes = [8, 128], strides = [1, 1]} : vector<64x128xf32> to vector<8x128xf32>
    %cst_9 = arith.constant dense<0.000000e+00> : vector<8x128xf32>
    %10 = tpu.matmul %7, %6, %cst_9 {dimension_numbers = #tpu.dot_dimension_numbers<[1], [0], [0], [1], [0, 0, 1, 1], [], []>} : vector<8x32xf32>, vector<32x128xf32>, vector<8x128xf32> -> vector<8x128xf32>
    %11 = arith.addf %9, %10 : vector<8x128xf32>
    %12 = arith.negf %11 : vector<8x128xf32>
    %13 = math.exp %12 : vector<8x128xf32>
    %cst_10 = arith.constant 1.000000e+00 : f32
    %14 = vector.broadcast %cst_10 : f32 to vector<8x128xf32>
    %15 = arith.addf %14, %13 : vector<8x128xf32>
    %16 = arith.divf %14, %15 : vector<8x128xf32>
    %17 = math.tanh %11 : vector<8x128xf32>
    %18 = vector.extract_strided_slice %16 {offsets = [0, 0], sizes = [8, 32], strides = [1, 1]} : vector<8x128xf32> to vector<8x32xf32>
    %19 = vector.extract_strided_slice %16 {offsets = [0, 32], sizes = [8, 32], strides = [1, 1]} : vector<8x128xf32> to vector<8x32xf32>
    %20 = vector.extract_strided_slice %17 {offsets = [0, 64], sizes = [8, 32], strides = [1, 1]} : vector<8x128xf32> to vector<8x32xf32>
    %21 = vector.extract_strided_slice %16 {offsets = [0, 96], sizes = [8, 32], strides = [1, 1]} : vector<8x128xf32> to vector<8x32xf32>
    %22 = arith.mulf %19, %8 : vector<8x32xf32>
    %23 = arith.mulf %18, %20 : vector<8x32xf32>
    %24 = arith.addf %22, %23 : vector<8x32xf32>
    %25 = math.tanh %24 : vector<8x32xf32>
    %26 = arith.mulf %21, %25 : vector<8x32xf32>
    %27 = vector.extract_strided_slice %5 {offsets = [8, 0], sizes = [8, 128], strides = [1, 1]} : vector<64x128xf32> to vector<8x128xf32>
    %cst_11 = arith.constant dense<0.000000e+00> : vector<8x128xf32>
    %28 = tpu.matmul %26, %6, %cst_11 {dimension_numbers = #tpu.dot_dimension_numbers<[1], [0], [0], [1], [0, 0, 1, 1], [], []>} : vector<8x32xf32>, vector<32x128xf32>, vector<8x128xf32> -> vector<8x128xf32>
    %29 = arith.addf %27, %28 : vector<8x128xf32>
    %30 = arith.negf %29 : vector<8x128xf32>
    %31 = math.exp %30 : vector<8x128xf32>
    %cst_12 = arith.constant 1.000000e+00 : f32
    %32 = vector.broadcast %cst_12 : f32 to vector<8x128xf32>
    %33 = arith.addf %32, %31 : vector<8x128xf32>
    %34 = arith.divf %32, %33 : vector<8x128xf32>
    %35 = math.tanh %29 : vector<8x128xf32>
    %36 = vector.extract_strided_slice %34 {offsets = [0, 0], sizes = [8, 32], strides = [1, 1]} : vector<8x128xf32> to vector<8x32xf32>
    %37 = vector.extract_strided_slice %34 {offsets = [0, 32], sizes = [8, 32], strides = [1, 1]} : vector<8x128xf32> to vector<8x32xf32>
    %38 = vector.extract_strided_slice %35 {offsets = [0, 64], sizes = [8, 32], strides = [1, 1]} : vector<8x128xf32> to vector<8x32xf32>
    %39 = vector.extract_strided_slice %34 {offsets = [0, 96], sizes = [8, 32], strides = [1, 1]} : vector<8x128xf32> to vector<8x32xf32>
    %40 = arith.mulf %37, %24 : vector<8x32xf32>
    %41 = arith.mulf %36, %38 : vector<8x32xf32>
    %42 = arith.addf %40, %41 : vector<8x32xf32>
    %43 = math.tanh %42 : vector<8x32xf32>
    %44 = arith.mulf %39, %43 : vector<8x32xf32>
    %45 = vector.extract_strided_slice %5 {offsets = [16, 0], sizes = [8, 128], strides = [1, 1]} : vector<64x128xf32> to vector<8x128xf32>
    %cst_13 = arith.constant dense<0.000000e+00> : vector<8x128xf32>
    %46 = tpu.matmul %44, %6, %cst_13 {dimension_numbers = #tpu.dot_dimension_numbers<[1], [0], [0], [1], [0, 0, 1, 1], [], []>} : vector<8x32xf32>, vector<32x128xf32>, vector<8x128xf32> -> vector<8x128xf32>
    %47 = arith.addf %45, %46 : vector<8x128xf32>
    %48 = arith.negf %47 : vector<8x128xf32>
    %49 = math.exp %48 : vector<8x128xf32>
    %cst_14 = arith.constant 1.000000e+00 : f32
    %50 = vector.broadcast %cst_14 : f32 to vector<8x128xf32>
    %51 = arith.addf %50, %49 : vector<8x128xf32>
    %52 = arith.divf %50, %51 : vector<8x128xf32>
    %53 = math.tanh %47 : vector<8x128xf32>
    %54 = vector.extract_strided_slice %52 {offsets = [0, 0], sizes = [8, 32], strides = [1, 1]} : vector<8x128xf32> to vector<8x32xf32>
    %55 = vector.extract_strided_slice %52 {offsets = [0, 32], sizes = [8, 32], strides = [1, 1]} : vector<8x128xf32> to vector<8x32xf32>
    %56 = vector.extract_strided_slice %53 {offsets = [0, 64], sizes = [8, 32], strides = [1, 1]} : vector<8x128xf32> to vector<8x32xf32>
    %57 = vector.extract_strided_slice %52 {offsets = [0, 96], sizes = [8, 32], strides = [1, 1]} : vector<8x128xf32> to vector<8x32xf32>
    %58 = arith.mulf %55, %42 : vector<8x32xf32>
    %59 = arith.mulf %54, %56 : vector<8x32xf32>
    %60 = arith.addf %58, %59 : vector<8x32xf32>
    %61 = math.tanh %60 : vector<8x32xf32>
    %62 = arith.mulf %57, %61 : vector<8x32xf32>
    %63 = vector.extract_strided_slice %5 {offsets = [24, 0], sizes = [8, 128], strides = [1, 1]} : vector<64x128xf32> to vector<8x128xf32>
    %cst_15 = arith.constant dense<0.000000e+00> : vector<8x128xf32>
    %64 = tpu.matmul %62, %6, %cst_15 {dimension_numbers = #tpu.dot_dimension_numbers<[1], [0], [0], [1], [0, 0, 1, 1], [], []>} : vector<8x32xf32>, vector<32x128xf32>, vector<8x128xf32> -> vector<8x128xf32>
    %65 = arith.addf %63, %64 : vector<8x128xf32>
    %66 = arith.negf %65 : vector<8x128xf32>
    %67 = math.exp %66 : vector<8x128xf32>
    %cst_16 = arith.constant 1.000000e+00 : f32
    %68 = vector.broadcast %cst_16 : f32 to vector<8x128xf32>
    %69 = arith.addf %68, %67 : vector<8x128xf32>
    %70 = arith.divf %68, %69 : vector<8x128xf32>
    %71 = math.tanh %65 : vector<8x128xf32>
    %72 = vector.extract_strided_slice %70 {offsets = [0, 0], sizes = [8, 32], strides = [1, 1]} : vector<8x128xf32> to vector<8x32xf32>
    %73 = vector.extract_strided_slice %70 {offsets = [0, 32], sizes = [8, 32], strides = [1, 1]} : vector<8x128xf32> to vector<8x32xf32>
    %74 = vector.extract_strided_slice %71 {offsets = [0, 64], sizes = [8, 32], strides = [1, 1]} : vector<8x128xf32> to vector<8x32xf32>
    %75 = vector.extract_strided_slice %70 {offsets = [0, 96], sizes = [8, 32], strides = [1, 1]} : vector<8x128xf32> to vector<8x32xf32>
    %76 = arith.mulf %73, %60 : vector<8x32xf32>
    %77 = arith.mulf %72, %74 : vector<8x32xf32>
    %78 = arith.addf %76, %77 : vector<8x32xf32>
    %79 = math.tanh %78 : vector<8x32xf32>
    %80 = arith.mulf %75, %79 : vector<8x32xf32>
    %81 = vector.extract_strided_slice %5 {offsets = [32, 0], sizes = [8, 128], strides = [1, 1]} : vector<64x128xf32> to vector<8x128xf32>
    %cst_17 = arith.constant dense<0.000000e+00> : vector<8x128xf32>
    %82 = tpu.matmul %80, %6, %cst_17 {dimension_numbers = #tpu.dot_dimension_numbers<[1], [0], [0], [1], [0, 0, 1, 1], [], []>} : vector<8x32xf32>, vector<32x128xf32>, vector<8x128xf32> -> vector<8x128xf32>
    %83 = arith.addf %81, %82 : vector<8x128xf32>
    %84 = arith.negf %83 : vector<8x128xf32>
    %85 = math.exp %84 : vector<8x128xf32>
    %cst_18 = arith.constant 1.000000e+00 : f32
    %86 = vector.broadcast %cst_18 : f32 to vector<8x128xf32>
    %87 = arith.addf %86, %85 : vector<8x128xf32>
    %88 = arith.divf %86, %87 : vector<8x128xf32>
    %89 = math.tanh %83 : vector<8x128xf32>
    %90 = vector.extract_strided_slice %88 {offsets = [0, 0], sizes = [8, 32], strides = [1, 1]} : vector<8x128xf32> to vector<8x32xf32>
    %91 = vector.extract_strided_slice %88 {offsets = [0, 32], sizes = [8, 32], strides = [1, 1]} : vector<8x128xf32> to vector<8x32xf32>
    %92 = vector.extract_strided_slice %89 {offsets = [0, 64], sizes = [8, 32], strides = [1, 1]} : vector<8x128xf32> to vector<8x32xf32>
    %93 = vector.extract_strided_slice %88 {offsets = [0, 96], sizes = [8, 32], strides = [1, 1]} : vector<8x128xf32> to vector<8x32xf32>
    %94 = arith.mulf %91, %78 : vector<8x32xf32>
    %95 = arith.mulf %90, %92 : vector<8x32xf32>
    %96 = arith.addf %94, %95 : vector<8x32xf32>
    %97 = math.tanh %96 : vector<8x32xf32>
    %98 = arith.mulf %93, %97 : vector<8x32xf32>
    %99 = vector.extract_strided_slice %5 {offsets = [40, 0], sizes = [8, 128], strides = [1, 1]} : vector<64x128xf32> to vector<8x128xf32>
    %cst_19 = arith.constant dense<0.000000e+00> : vector<8x128xf32>
    %100 = tpu.matmul %98, %6, %cst_19 {dimension_numbers = #tpu.dot_dimension_numbers<[1], [0], [0], [1], [0, 0, 1, 1], [], []>} : vector<8x32xf32>, vector<32x128xf32>, vector<8x128xf32> -> vector<8x128xf32>
    %101 = arith.addf %99, %100 : vector<8x128xf32>
    %102 = arith.negf %101 : vector<8x128xf32>
    %103 = math.exp %102 : vector<8x128xf32>
    %cst_20 = arith.constant 1.000000e+00 : f32
    %104 = vector.broadcast %cst_20 : f32 to vector<8x128xf32>
    %105 = arith.addf %104, %103 : vector<8x128xf32>
    %106 = arith.divf %104, %105 : vector<8x128xf32>
    %107 = math.tanh %101 : vector<8x128xf32>
    %108 = vector.extract_strided_slice %106 {offsets = [0, 0], sizes = [8, 32], strides = [1, 1]} : vector<8x128xf32> to vector<8x32xf32>
    %109 = vector.extract_strided_slice %106 {offsets = [0, 32], sizes = [8, 32], strides = [1, 1]} : vector<8x128xf32> to vector<8x32xf32>
    %110 = vector.extract_strided_slice %107 {offsets = [0, 64], sizes = [8, 32], strides = [1, 1]} : vector<8x128xf32> to vector<8x32xf32>
    %111 = vector.extract_strided_slice %106 {offsets = [0, 96], sizes = [8, 32], strides = [1, 1]} : vector<8x128xf32> to vector<8x32xf32>
    %112 = arith.mulf %109, %96 : vector<8x32xf32>
    %113 = arith.mulf %108, %110 : vector<8x32xf32>
    %114 = arith.addf %112, %113 : vector<8x32xf32>
    %115 = math.tanh %114 : vector<8x32xf32>
    %116 = arith.mulf %111, %115 : vector<8x32xf32>
    %117 = vector.extract_strided_slice %5 {offsets = [48, 0], sizes = [8, 128], strides = [1, 1]} : vector<64x128xf32> to vector<8x128xf32>
    %cst_21 = arith.constant dense<0.000000e+00> : vector<8x128xf32>
    %118 = tpu.matmul %116, %6, %cst_21 {dimension_numbers = #tpu.dot_dimension_numbers<[1], [0], [0], [1], [0, 0, 1, 1], [], []>} : vector<8x32xf32>, vector<32x128xf32>, vector<8x128xf32> -> vector<8x128xf32>
    %119 = arith.addf %117, %118 : vector<8x128xf32>
    %120 = arith.negf %119 : vector<8x128xf32>
    %121 = math.exp %120 : vector<8x128xf32>
    %cst_22 = arith.constant 1.000000e+00 : f32
    %122 = vector.broadcast %cst_22 : f32 to vector<8x128xf32>
    %123 = arith.addf %122, %121 : vector<8x128xf32>
    %124 = arith.divf %122, %123 : vector<8x128xf32>
    %125 = math.tanh %119 : vector<8x128xf32>
    %126 = vector.extract_strided_slice %124 {offsets = [0, 0], sizes = [8, 32], strides = [1, 1]} : vector<8x128xf32> to vector<8x32xf32>
    %127 = vector.extract_strided_slice %124 {offsets = [0, 32], sizes = [8, 32], strides = [1, 1]} : vector<8x128xf32> to vector<8x32xf32>
    %128 = vector.extract_strided_slice %125 {offsets = [0, 64], sizes = [8, 32], strides = [1, 1]} : vector<8x128xf32> to vector<8x32xf32>
    %129 = vector.extract_strided_slice %124 {offsets = [0, 96], sizes = [8, 32], strides = [1, 1]} : vector<8x128xf32> to vector<8x32xf32>
    %130 = arith.mulf %127, %114 : vector<8x32xf32>
    %131 = arith.mulf %126, %128 : vector<8x32xf32>
    %132 = arith.addf %130, %131 : vector<8x32xf32>
    %133 = math.tanh %132 : vector<8x32xf32>
    %134 = arith.mulf %129, %133 : vector<8x32xf32>
    %135 = vector.extract_strided_slice %5 {offsets = [56, 0], sizes = [8, 128], strides = [1, 1]} : vector<64x128xf32> to vector<8x128xf32>
    %cst_23 = arith.constant dense<0.000000e+00> : vector<8x128xf32>
    %136 = tpu.matmul %134, %6, %cst_23 {dimension_numbers = #tpu.dot_dimension_numbers<[1], [0], [0], [1], [0, 0, 1, 1], [], []>} : vector<8x32xf32>, vector<32x128xf32>, vector<8x128xf32> -> vector<8x128xf32>
    %137 = arith.addf %135, %136 : vector<8x128xf32>
    %138 = arith.negf %137 : vector<8x128xf32>
    %139 = math.exp %138 : vector<8x128xf32>
    %cst_24 = arith.constant 1.000000e+00 : f32
    %140 = vector.broadcast %cst_24 : f32 to vector<8x128xf32>
    %141 = arith.addf %140, %139 : vector<8x128xf32>
    %142 = arith.divf %140, %141 : vector<8x128xf32>
    %143 = math.tanh %137 : vector<8x128xf32>
    %144 = vector.extract_strided_slice %142 {offsets = [0, 0], sizes = [8, 32], strides = [1, 1]} : vector<8x128xf32> to vector<8x32xf32>
    %145 = vector.extract_strided_slice %142 {offsets = [0, 32], sizes = [8, 32], strides = [1, 1]} : vector<8x128xf32> to vector<8x32xf32>
    %146 = vector.extract_strided_slice %143 {offsets = [0, 64], sizes = [8, 32], strides = [1, 1]} : vector<8x128xf32> to vector<8x32xf32>
    %147 = vector.extract_strided_slice %142 {offsets = [0, 96], sizes = [8, 32], strides = [1, 1]} : vector<8x128xf32> to vector<8x32xf32>
    %148 = arith.mulf %145, %132 : vector<8x32xf32>
    %149 = arith.mulf %144, %146 : vector<8x32xf32>
    %150 = arith.addf %148, %149 : vector<8x32xf32>
    %151 = math.tanh %150 : vector<8x32xf32>
    %152 = arith.mulf %147, %151 : vector<8x32xf32>
    %c0_25 = arith.constant 0 : index
    %c0_26 = arith.constant 0 : index
    %153 = vector.load %arg4[%c0_25, %c0_26] : memref<32x12xf32, #tpu.memory_space<vmem>>, vector<32x12xf32>
    %cst_27 = arith.constant dense<0.000000e+00> : vector<8x12xf32>
    %154 = tpu.matmul %152, %153, %cst_27 {dimension_numbers = #tpu.dot_dimension_numbers<[1], [0], [0], [1], [0, 0, 1, 1], [], []>} : vector<8x32xf32>, vector<32x12xf32>, vector<8x12xf32> -> vector<8x12xf32>
    %c0_28 = arith.constant 0 : index
    %c0_29 = arith.constant 0 : index
    %155 = vector.load %arg5[%c0_28, %c0_29] : memref<1x12xf32, #tpu.memory_space<vmem>>, vector<1x12xf32>
    %156 = vector.broadcast %155 : vector<1x12xf32> to vector<8x12xf32>
    %157 = arith.addf %154, %156 : vector<8x12xf32>
    %158 = arith.negf %157 : vector<8x12xf32>
    %159 = math.exp %158 : vector<8x12xf32>
    %cst_30 = arith.constant 1.000000e+00 : f32
    %160 = vector.broadcast %cst_30 : f32 to vector<8x12xf32>
    %161 = arith.addf %160, %159 : vector<8x12xf32>
    %162 = arith.divf %160, %161 : vector<8x12xf32>
    %c0_31 = arith.constant 0 : index
    %c0_32 = arith.constant 0 : index
    %163 = vector.load %arg6[%c0_31, %c0_32] : memref<8x12xf32, #tpu.memory_space<vmem>>, vector<8x12xf32>
    tpu.vector_store %arg6[%c0_31, %c0_32], %162 {strides = array<i32>} : memref<8x12xf32, #tpu.memory_space<vmem>>, vector<8x12xf32>,
    return
  }
}

</mosaic_0001>

<bundles_post_ra>
// kernel: tpu_custom_call.1
= control target key start
LH: loop header
LB: loop body
LE: loop exit
PB: predicated region body
PF: predicated region fallthrough
CT: control target
= control target key end

     0   :  { %vm41_vm0 = vcmask 130048   ;;  %v1435_v3 = vmov 0.0|0.0   ;;  %vm1436_vm1 = vmmov 0   ;;  %v1437_v10 = vmov 0.0   ;;  %s1675_s0 = inlined_call_operand.vmem [shape: f32[64,16], index: 0, kind: input, shape index: {}]   ;;  %s1676_s1 = inlined_call_operand.vmem [shape: f32[16,128], index: 1, kind: input, shape index: {}]   ;;  %s1677_s2 = inlined_call_operand.vmem [shape: f32[32,128], index: 2, kind: input, shape index: {}]   ;;  %s1678_s3 = inlined_call_operand.vmem [shape: f32[1,128], index: 3, kind: input, shape index: {}]   ;;  %s1679_s4 = inlined_call_operand.vmem [shape: f32[32,12], index: 4, kind: input, shape index: {}]   ;;  %s1680_s5 = inlined_call_operand.vmem [shape: f32[1,12], index: 5, kind: input, shape index: {}]   ;;  %s1681_s6 = inlined_call_operand.hbm [shape: f32[8,12], index: 6, kind: output, shape index: {}]  }
   0x1   :  { %v32_v0 = vld [vmem:[%s1676_s1] sm:$0xff]  ;;  %v33_v1 = vld [vmem:[%s1676_s1 + $0x8] sm:$0xff]  ;;  %1283 = vmatprep.subr.bf16.mxu1 %v1435_v3  ;;  %v173_v8 = vld [vmem:[%s1677_s2 + $0x10] sm:$0xff]  ;;  %1188 = vmatprep.mubr.msk.f32.mxu1 %vm1436_vm1, %v1437_v10 }
   0x2   :  { %v171_v2 = vld [vmem:[%s1677_s2] sm:$0xff]  ;;  %v1279_v4 = vpack.c.bf16 %v33_v1, %v32_v0  ;;  %v172_v5 = vld [vmem:[%s1677_s2 + $0x8] sm:$0xff]  ;;  %v174_v9 = vld [vmem:[%s1677_s2 + $0x18] sm:$0xff] }
   0x3   :  { %v24_v6 = vld [vmem:[%s1675_s0] sm:$0xff]  ;;  %v1492_v7 = vpack.c.bf16 %v172_v5, %v171_v2 }
   0x4   :  { %1168 = vmatprep.mubr.msk.f32.mxu0 %vm41_vm0, %v24_v6 }
   0x5   :  { %11 = vsyncpa [#allocation3], 0  ;;  %1280 = vmatprep.subr.bf16.mxu0 %v1279_v4  ;;  %1285 = vmatpush3.bf16.msra.mxu1 %v1492_v7  ;;  %v25_v11 = vld [vmem:[%s1675_s0 + $0x8] sm:$0xff]  ;;  %v1507_v12 = vpack.c.bf16 %v174_v9, %v173_v8  ;;  %v1528_v13 = vld [vmem:[%s1678_s3] ss:$0 sm:$0xff]  ;;  %s1438_s13 = smov 64  }
   0x6   :  { %1282 = vmatpush3.bf16.msra.mxu0 %v1279_v4  ;;  %1286 = vmatprep.subr.bf16.mxu1 %v1435_v3  ;;  %s1439_s3 = smov 32   ;;  %vm175_vm2 = vcmask 261120   ;;  %v26_v48 = vld [vmem:[%s1675_s0 + $0x10] sm:$0xff]  ;;  %v27_v49 = vld [vmem:[%s1675_s0 + $0x18] sm:$0xff]  ;;  %v28_v50 = vld [vmem:[%s1675_s0 + $0x20] sm:$0xff]  ;;  %vm1066_vm3 = vcmask 97280  }
   0x7   :  { %1295 = vmatprep.subr.bf16.mxu0 %v1435_v3  ;;  %v29_v51 = vld [vmem:[%s1675_s0 + $0x28] sm:$0xff]  ;;  %v30_v52 = vld [vmem:[%s1675_s0 + $0x30] sm:$0xff]  ;;  %v31_v53 = vld [vmem:[%s1675_s0 + $0x38] sm:$0xff] }
   0x9   :  { %1169 = vmatmul.mubr.msk.f32.vlgmr.msra.gmra.mrb[0].mxu0 %vm41_vm0, %v25_v11  ;;  %1288 = vmatpush3.bf16.msra.mxu1 %v1507_v12 }
   0xa   :  { %1297 = vmatpush3.bf16.msra.mxu0 %v1492_v7  ;;  %1289 = vmatprep.subr.bf16.mxu1 %v1435_v3 }
   0xb   :  { %1298 = vmatprep.subr.bf16.mxu0 %v1435_v3  ;;  %1171 = vmatprep.mubr.msk.f32.mxu0 %vm41_vm0, %v26_v48 }
   0xc   :  { %1189 = vmatmul.mubr.f32.vlgmr.msra.gmra.mrb[0].mxu1 %v1437_v10 }
   0xd   :  { %1291 = vmatpush3.bf16.msra.mxu1 %v1492_v7  ;;  %1199 = vmatprep.mubr.msk.f32.mxu1 %vm1436_vm1, %v1437_v10 }
   0xe   :  { %1292 = vmatprep.subr.bf16.mxu1 %v1435_v3  ;;  %1300 = vmatpush3.bf16.msra.mxu0 %v1507_v12 }
   0xf   :  { %1307 = vmatprep.subr.bf16.mxu0 %v1435_v3  ;;  %1172 = vmatmul.mubr.msk.f32.gmra.mrb[2].mxu0 %vm41_vm0, %v27_v49 }
  0x10   :  { %1174 = vmatprep.mubr.msk.f32.mxu0 %vm41_vm0, %v28_v50 }
  0x11   :  { %1294 = vmatpush3.bf16.msra.mxu1 %v1507_v12 }
  0x12   :  { %1301 = vmatprep.subr.bf16.mxu1 %v1435_v3 }
  0x13   :  { %1175 = vmatmul.mubr.msk.f32.gmra.mrb[4].mxu0 %vm41_vm0, %v29_v51 }
  0x14   :  { %1177 = vmatprep.mubr.msk.f32.mxu0 %vm41_vm0, %v30_v52 }
  0x17   :  { %1178 = vmatmul.mubr.msk.f32.gmra.mrb[6].mxu0 %vm41_vm0, %v31_v53 }
  0x18   :  { %1210 = vmatprep.mubr.msk.f32.mxu0 %vm1436_vm1, %v1437_v10 }
  0xdc   :  { %v1170_v14 = vpop.f32.mrb[0].mxu0 }
  0xdd   :  { %v132_v15 = vpop.f32.mrb[1].mxu0  ;;  %v138_v34 = vadd.f32 %v1170_v14, %v1528_v13 }
  0xde   :  { %v133_v16 = vadd.f32 %v1528_v13, %v132_v15 }
  0xdf   :  { %v245_v17 = vpop.f32.mrb[0].mxu1 }
  0xe0   :  { %v249_v18 = vadd.f32 %v245_v17, %v133_v16  ;;  %v1190_v19 = vpop.f32.mrb[1].mxu1 }
  0xe2   :  { %1343 = vtanh.f32 %v249_v18  ;;  %v1091_v21 = vmul.f32 -1.442695, %v249_v18  ;;  %v1173_v57 = vpop.f32.mrb[2].mxu0 }
  0xe3   :  { %v142_v58 = vpop.f32.mrb[3].mxu0 }
  0xe4   :  { %1345 = vpow2.f32 %v1091_v21  ;;  %v143_v0 = vadd.f32 %v1528_v13, %v142_v58 }
  0xe6   :  { %v1573_v59 = vpop.f32.mrb[4].mxu0 }
  0xe7   :  { %v1575_v60 = vpop.f32.mrb[5].mxu0 }
  0xea   :  { %v1577_v61 = vpop.f32.mrb[6].mxu0 }
  0xeb   :  { %v1579_v62 = vpop.f32.mrb[7].mxu0 }
  0xec   :  { %v1344_v20 = vpop.eup %1343 }
  0xed   :  { %259 = vrot.lane.b32.xlu0 %v1344_v20, %s1438_s13 }
  0xee   :  { %v1346_v22 = vpop.eup %1345 }
  0xef   :  { %v253_v23 = vadd.f32 1.0, %v1346_v22 }
  0xf1   :  { %1347 = vrcp.f32 %v253_v23  ;;  %v148_v23 = vadd.f32 %v1173_v57, %v1528_v13 }
  0xfb   :  { %v1348_v24 = vpop.eup %1347 }
  0xfc   :  { %v257_v27 = vmul.f32 0.0, %v1348_v24 }
 0x15f   :  { %v260_v25 = vpop.permute.xlu0 %259 }
 0x160   :  { %v262_v26 = vmul.f32 %v1348_v24, %v260_v25 }
 0x162   :  { %264 = vrot.lane.b32.xlu0 %v262_v26, %s1439_s3 }
 0x1d4   :  { %v265_v28 = vpop.permute.xlu0 %264 }
 0x1d5   :  { %v267_v29 = vadd.f32 %v265_v28, %v257_v27 }
 0x1d7   :  { %1349 = vtanh.f32 %v267_v29 }
 0x1e1   :  { %v1350_v30 = vpop.eup %1349 }
 0x1e2   :  { %270 = vrot.lane.b32.xlu1 %v1350_v30, %s1438_s13 }
 0x254   :  { %v271_v31 = vpop.permute.xlu1 %270 }
 0x255   :  { %v273_v32 = vmul.f32 %v1348_v24, %v271_v31 }
 0x257   :  { %275 = vrot.lane.b32.xlu1 %v273_v32, %s1439_s3 }
 0x2c9   :  { %v276_v33 = vpop.permute.xlu1 %275 }
 0x2ca   :  { %1200 = vmatmul.mubr.msk.f32.vlgmr.msra.gmra.mrb[2].mxu1 %vm175_vm2, %v276_v33 }
 0x2cb   :  { %1303 = vmatpush3.bf16.msra.mxu1 %v1492_v7  ;;  %1221 = vmatprep.mubr.msk.f32.mxu1 %vm1436_vm1, %v1437_v10 }
 0x2cc   :  { %1304 = vmatprep.subr.bf16.mxu1 %v1435_v3 }
 0x2cf   :  { %1306 = vmatpush3.bf16.msra.mxu1 %v1507_v12 }
 0x2d0   :  { %1313 = vmatprep.subr.bf16.mxu1 %v1435_v3 }
 0x39d   :  { %v345_v35 = vpop.f32.mrb[2].mxu1 }
 0x39e   :  { %v349_v36 = vadd.f32 %v345_v35, %v138_v34  ;;  %v1201_v37 = vpop.f32.mrb[3].mxu1 }
 0x3a0   :  { %1351 = vtanh.f32 %v349_v36  ;;  %v1093_v39 = vmul.f32 -1.442695, %v349_v36 }
 0x3a2   :  { %1353 = vpow2.f32 %v1093_v39 }
 0x3aa   :  { %v1352_v38 = vpop.eup %1351 }
 0x3ab   :  { %359 = vrot.lane.b32.xlu0 %v1352_v38, %s1438_s13 }
 0x3ac   :  { %v1354_v40 = vpop.eup %1353 }
 0x3ad   :  { %v353_v41 = vadd.f32 1.0, %v1354_v40 }
 0x3af   :  { %1355 = vrcp.f32 %v353_v41  ;;  %v153_v41 = vadd.f32 %v1528_v13, %v1575_v60  ;;  %v158_v60 = vadd.f32 %v1573_v59, %v1528_v13 }
 0x3b9   :  { %v1356_v42 = vpop.eup %1355 }
 0x3ba   :  { %v357_v45 = vmul.f32 %v1356_v42, %v267_v29 }
 0x41d   :  { %v360_v43 = vpop.permute.xlu0 %359 }
 0x41e   :  { %v362_v44 = vmul.f32 %v1356_v42, %v360_v43 }
 0x420   :  { %364 = vrot.lane.b32.xlu1 %v362_v44, %s1439_s3 }
 0x492   :  { %v365_v46 = vpop.permute.xlu1 %364 }
 0x493   :  { %v367_v47 = vadd.f32 %v365_v46, %v357_v45 }
 0x495   :  { %1357 = vtanh.f32 %v367_v47 }
 0x49f   :  { %v1358_v54 = vpop.eup %1357 }
 0x4a0   :  { %370 = vrot.lane.b32.xlu0 %v1358_v54, %s1438_s13 }
 0x512   :  { %v371_v55 = vpop.permute.xlu0 %370 }
 0x513   :  { %v373_v56 = vmul.f32 %v1356_v42, %v371_v55 }
 0x515   :  { %375 = vrot.lane.b32.xlu1 %v373_v56, %s1439_s3 }
 0x587   :  { %v376_v63 = vpop.permute.xlu1 %375 }
 0x588   :  { %1211 = vmatmul.mubr.msk.f32.vlgmr.msra.gmra.mrb[8].mxu0 %vm175_vm2, %v376_v63 }
 0x589   :  { %1309 = vmatpush3.bf16.msra.mxu0 %v1492_v7  ;;  %1232 = vmatprep.mubr.msk.f32.mxu0 %vm1436_vm1, %v1437_v10 }
 0x58a   :  { %1310 = vmatprep.subr.bf16.mxu0 %v1435_v3 }
 0x58d   :  { %1312 = vmatpush3.bf16.msra.mxu0 %v1507_v12 }
 0x58e   :  { %1319 = vmatprep.subr.bf16.mxu0 %v1435_v3 }
 0x65b   :  { %v445_v1 = vpop.f32.mrb[8].mxu0 }
 0x65c   :  { %v449_v2 = vadd.f32 %v445_v1, %v143_v0  ;;  %v1212_v4 = vpop.f32.mrb[9].mxu0 }
 0x65e   :  { %1359 = vtanh.f32 %v449_v2  ;;  %v1095_v6 = vmul.f32 -1.442695, %v449_v2 }
 0x660   :  { %1361 = vpow2.f32 %v1095_v6 }
 0x668   :  { %v1360_v5 = vpop.eup %1359 }
 0x669   :  { %459 = vrot.lane.b32.xlu0 %v1360_v5, %s1438_s13 }
 0x66a   :  { %v1362_v8 = vpop.eup %1361 }
 0x66b   :  { %v453_v9 = vadd.f32 1.0, %v1362_v8 }
 0x66d   :  { %1363 = vrcp.f32 %v453_v9 }
 0x677   :  { %v1364_v11 = vpop.eup %1363 }
 0x678   :  { %v457_v16 = vmul.f32 %v1364_v11, %v367_v47 }
 0x6db   :  { %v460_v14 = vpop.permute.xlu0 %459 }
 0x6dc   :  { %v462_v15 = vmul.f32 %v1364_v11, %v460_v14 }
 0x6de   :  { %464 = vrot.lane.b32.xlu1 %v462_v15, %s1439_s3 }
 0x750   :  { %v465_v17 = vpop.permute.xlu1 %464 }
 0x751   :  { %v467_v18 = vadd.f32 %v465_v17, %v457_v16 }
 0x753   :  { %1365 = vtanh.f32 %v467_v18 }
 0x75d   :  { %v1366_v19 = vpop.eup %1365 }
 0x75e   :  { %470 = vrot.lane.b32.xlu0 %v1366_v19, %s1438_s13 }
 0x7d0   :  { %v471_v20 = vpop.permute.xlu0 %470 }
 0x7d1   :  { %v473_v21 = vmul.f32 %v1364_v11, %v471_v20 }
 0x7d3   :  { %475 = vrot.lane.b32.xlu1 %v473_v21, %s1439_s3 }
 0x845   :  { %v476_v22 = vpop.permute.xlu1 %475 }
 0x846   :  { %1222 = vmatmul.mubr.msk.f32.vlgmr.msra.gmra.mrb[4].mxu1 %vm175_vm2, %v476_v22 }
 0x847   :  { %1315 = vmatpush3.bf16.msra.mxu1 %v1492_v7  ;;  %1243 = vmatprep.mubr.msk.f32.mxu1 %vm1436_vm1, %v1437_v10 }
 0x848   :  { %1316 = vmatprep.subr.bf16.mxu1 %v1435_v3 }
 0x84b   :  { %1318 = vmatpush3.bf16.msra.mxu1 %v1507_v12 }
 0x84c   :  { %1325 = vmatprep.subr.bf16.mxu1 %v1435_v3 }
 0x919   :  { %v545_v24 = vpop.f32.mrb[4].mxu1 }
 0x91a   :  { %v549_v25 = vadd.f32 %v545_v24, %v148_v23  ;;  %v1223_v26 = vpop.f32.mrb[5].mxu1 }
 0x91c   :  { %1367 = vtanh.f32 %v549_v25  ;;  %v1097_v28 = vmul.f32 -1.442695, %v549_v25 }
 0x91e   :  { %1369 = vpow2.f32 %v1097_v28 }
 0x926   :  { %v1368_v27 = vpop.eup %1367 }
 0x927   :  { %559 = vrot.lane.b32.xlu0 %v1368_v27, %s1438_s13 }
 0x928   :  { %v1370_v29 = vpop.eup %1369 }
 0x929   :  { %v553_v30 = vadd.f32 1.0, %v1370_v29 }
 0x92b   :  { %1371 = vrcp.f32 %v553_v30 }
 0x935   :  { %v1372_v31 = vpop.eup %1371 }
 0x936   :  { %v557_v34 = vmul.f32 %v1372_v31, %v467_v18  ;;  %v163_v18 = vadd.f32 %v1528_v13, %v1579_v62 }
 0x999   :  { %v560_v32 = vpop.permute.xlu0 %559 }
 0x99a   :  { %v562_v33 = vmul.f32 %v1372_v31, %v560_v32 }
 0x99c   :  { %564 = vrot.lane.b32.xlu1 %v562_v33, %s1439_s3 }
 0xa0e   :  { %v565_v35 = vpop.permute.xlu1 %564 }
 0xa0f   :  { %v567_v36 = vadd.f32 %v565_v35, %v557_v34  ;;  %v168_v34 = vadd.f32 %v1577_v61, %v1528_v13  ;;  %v974_v61 = vld [vmem:[%s1679_s4] sm:$0xff] }
 0xa11   :  { %1373 = vtanh.f32 %v567_v36 }
 0xa1b   :  { %v1374_v37 = vpop.eup %1373 }
 0xa1c   :  { %570 = vrot.lane.b32.xlu0 %v1374_v37, %s1438_s13 }
 0xa8e   :  { %v571_v38 = vpop.permute.xlu0 %570 }
 0xa8f   :  { %v573_v39 = vmul.f32 %v1372_v31, %v571_v38 }
 0xa91   :  { %575 = vrot.lane.b32.xlu1 %v573_v39, %s1439_s3 }
 0xb03   :  { %v576_v40 = vpop.permute.xlu1 %575 }
 0xb04   :  { %1233 = vmatmul.mubr.msk.f32.vlgmr.msra.gmra.mrb[10].mxu0 %vm175_vm2, %v576_v40 }
 0xb05   :  { %1321 = vmatpush3.bf16.msra.mxu0 %v1492_v7  ;;  %1254 = vmatprep.mubr.msk.f32.mxu0 %vm1436_vm1, %v1437_v10 }
 0xb06   :  { %1322 = vmatprep.subr.bf16.mxu0 %v1435_v3 }
 0xb09   :  { %1324 = vmatpush3.bf16.msra.mxu0 %v1507_v12 }
 0xb0a   :  { %1331 = vmatprep.subr.bf16.mxu0 %v1435_v3 }
 0xbd7   :  { %v645_v42 = vpop.f32.mrb[10].mxu0 }
 0xbd8   :  { %v649_v43 = vadd.f32 %v645_v42, %v153_v41  ;;  %v1234_v44 = vpop.f32.mrb[11].mxu0 }
 0xbda   :  { %1375 = vtanh.f32 %v649_v43  ;;  %v1099_v46 = vmul.f32 -1.442695, %v649_v43 }
 0xbdc   :  { %1377 = vpow2.f32 %v1099_v46 }
 0xbe4   :  { %v1376_v45 = vpop.eup %1375 }
 0xbe5   :  { %659 = vrot.lane.b32.xlu0 %v1376_v45, %s1438_s13 }
 0xbe6   :  { %v1378_v47 = vpop.eup %1377 }
 0xbe7   :  { %v653_v48 = vadd.f32 1.0, %v1378_v47  ;;  %v975_v47 = vld [vmem:[%s1679_s4 + $0x8] sm:$0xff] }
 0xbe9   :  { %1379 = vrcp.f32 %v653_v48  ;;  %v976_v48 = vld [vmem:[%s1679_s4 + $0x10] sm:$0xff] }
 0xbf3   :  { %v1380_v49 = vpop.eup %1379 }
 0xbf4   :  { %v657_v52 = vmul.f32 %v1380_v49, %v567_v36 }
 0xc57   :  { %v660_v50 = vpop.permute.xlu0 %659 }
 0xc58   :  { %v662_v51 = vmul.f32 %v1380_v49, %v660_v50  ;;  %v977_v50 = vld [vmem:[%s1679_s4 + $0x18] sm:$0xff]  ;;  %s1440_s4 = smov [#allocation2]  }
 0xc59   :  { %s1074_s10 = sshll.u32 %s1440_s4, 4  ;;  %s1075_s10 = int_to_ptr.vmem [resolvable:$true] %s1074_s10 }
 0xc5a   :  { %664 = vrot.lane.b32.xlu1 %v662_v51, %s1439_s3  ;;  %v1335_v51 = vpack.c.bf16 %v977_v50, %v976_v48  ;;  %s1411_s11 = scalar_lea.vmem %s1075_s10, 128  ;;  %p1416_p1 = scmp.lt.s32.totalorder %s1075_s10, %s1075_s10 }
 0xc5b   :  { %p1412_p0 = scmp.ne.s32.totalorder %s1075_s10, %s1411_s11  ;;  %p1417_p2 = scmp.lt.s32.totalorder %s1411_s11, %s1411_s11 }
 0xc5d   :  { %p1418_p3 = por %p1417_p2, %p1416_p1 }
 0xc5f   :  { %p1419_p4 = pnand %p1418_p3, %p1412_p0 }
 0xccc   :  { %v665_v53 = vpop.permute.xlu1 %664 }
 0xccd   :  { %v667_v54 = vadd.f32 %v665_v53, %v657_v52 }
 0xccf   :  { %1381 = vtanh.f32 %v667_v54 }
 0xcd9   :  { %v1382_v55 = vpop.eup %1381 }
 0xcda   :  { %670 = vrot.lane.b32.xlu0 %v1382_v55, %s1438_s13 }
 0xd4c   :  { %v671_v56 = vpop.permute.xlu0 %670 }
 0xd4d   :  { %v673_v57 = vmul.f32 %v1380_v49, %v671_v56  ;;  %v1332_v49 = vpack.c.bf16 %v975_v47, %v974_v61  ;;  %v1106_v56 = vld [vmem:[%s1680_s5] ss:$0 sm:$0xff] }
 0xd4f   :  { %675 = vrot.lane.b32.xlu1 %v673_v57, %s1439_s3 }
 0xdc1   :  { %v676_v58 = vpop.permute.xlu1 %675 }
 0xdc2   :  { %1244 = vmatmul.mubr.msk.f32.vlgmr.msra.gmra.mrb[6].mxu1 %vm175_vm2, %v676_v58 }
 0xdc3   :  { %1327 = vmatpush3.bf16.msra.mxu1 %v1492_v7  ;;  %1265 = vmatprep.mubr.msk.f32.mxu1 %vm1436_vm1, %v1437_v10 }
 0xdc4   :  { %1328 = vmatprep.subr.bf16.mxu1 %v1435_v3 }
 0xdc7   :  { %1330 = vmatpush3.bf16.msra.mxu1 %v1507_v12 }
 0xe95   :  { %v745_v63 = vpop.f32.mrb[6].mxu1 }
 0xe96   :  { %v749_v0 = vadd.f32 %v745_v63, %v158_v60  ;;  %v1245_v1 = vpop.f32.mrb[7].mxu1 }
 0xe98   :  { %1383 = vtanh.f32 %v749_v0  ;;  %v1101_v4 = vmul.f32 -1.442695, %v749_v0 }
 0xe9a   :  { %1385 = vpow2.f32 %v1101_v4 }
 0xea2   :  { %v1384_v2 = vpop.eup %1383 }
 0xea3   :  { %759 = vrot.lane.b32.xlu0 %v1384_v2, %s1438_s13 }
 0xea4   :  { %v1386_v7 = vpop.eup %1385 }
 0xea5   :  { %v753_v5 = vadd.f32 1.0, %v1386_v7 }
 0xea7   :  { %1387 = vrcp.f32 %v753_v5 }
 0xeb1   :  { %v1388_v6 = vpop.eup %1387 }
 0xeb2   :  { %v757_v12 = vmul.f32 %v1388_v6, %v667_v54 }
 0xf15   :  { %v760_v8 = vpop.permute.xlu0 %759 }
 0xf16   :  { %v762_v9 = vmul.f32 %v1388_v6, %v760_v8 }
 0xf18   :  { %764 = vrot.lane.b32.xlu1 %v762_v9, %s1439_s3 }
 0xf8a   :  { %v765_v11 = vpop.permute.xlu1 %764 }
 0xf8b   :  { %v767_v59 = vadd.f32 %v765_v11, %v757_v12 }
 0xf8d   :  { %1389 = vtanh.f32 %v767_v59 }
 0xf97   :  { %v1390_v14 = vpop.eup %1389 }
 0xf98   :  { %770 = vrot.lane.b32.xlu0 %v1390_v14, %s1438_s13 }
0x100a   :  { %v771_v15 = vpop.permute.xlu0 %770 }
0x100b   :  { %v773_v16 = vmul.f32 %v1388_v6, %v771_v15 }
0x100d   :  { %775 = vrot.lane.b32.xlu1 %v773_v16, %s1439_s3 }
0x107f   :  { %v776_v17 = vpop.permute.xlu1 %775 }
0x1080   :  { %1255 = vmatmul.mubr.msk.f32.vlgmr.msra.gmra.mrb[12].mxu0 %vm175_vm2, %v776_v17 }
0x1081   :  { %1276 = vmatprep.mubr.msk.f32.mxu0 %vm1436_vm1, %v1437_v10  ;;  %1333 = vmatpush3.bf16.msra.mxu0 %v1332_v49 }
0x1082   :  { %1334 = vmatprep.subr.bf16.mxu0 %v1435_v3 }
0x1085   :  { %1336 = vmatpush3.bf16.msra.mxu0 %v1335_v51 }
0x1153   :  { %v845_v19 = vpop.f32.mrb[12].mxu0 }
0x1154   :  { %v849_v20 = vadd.f32 %v845_v19, %v163_v18  ;;  %v1256_v21 = vpop.f32.mrb[13].mxu0 }
0x1156   :  { %1391 = vtanh.f32 %v849_v20  ;;  %v1103_v23 = vmul.f32 -1.442695, %v849_v20 }
0x1158   :  { %1393 = vpow2.f32 %v1103_v23 }
0x1160   :  { %v1392_v22 = vpop.eup %1391 }
0x1161   :  { %859 = vrot.lane.b32.xlu0 %v1392_v22, %s1438_s13 }
0x1162   :  { %v1394_v24 = vpop.eup %1393 }
0x1163   :  { %v853_v25 = vadd.f32 1.0, %v1394_v24 }
0x1165   :  { %1395 = vrcp.f32 %v853_v25 }
0x116f   :  { %v1396_v26 = vpop.eup %1395 }
0x1170   :  { %v857_v10 = vmul.f32 %v1396_v26, %v767_v59 }
0x11d3   :  { %v860_v27 = vpop.permute.xlu0 %859 }
0x11d4   :  { %v862_v28 = vmul.f32 %v1396_v26, %v860_v27 }
0x11d6   :  { %864 = vrot.lane.b32.xlu1 %v862_v28, %s1439_s3 }
0x1248   :  { %v865_v29 = vpop.permute.xlu1 %864 }
0x1249   :  { %v867_v62 = vadd.f32 %v865_v29, %v857_v10 }
0x124b   :  { %1397 = vtanh.f32 %v867_v62 }
0x1255   :  { %v1398_v30 = vpop.eup %1397 }
0x1256   :  { %870 = vrot.lane.b32.xlu0 %v1398_v30, %s1438_s13 }
0x12c8   :  { %v871_v31 = vpop.permute.xlu0 %870 }
0x12c9   :  { %v873_v32 = vmul.f32 %v1396_v26, %v871_v31 }
0x12cb   :  { %875 = vrot.lane.b32.xlu1 %v873_v32, %s1439_s3 }
0x133d   :  { %v876_v33 = vpop.permute.xlu1 %875 }
0x133e   :  { %1266 = vmatmul.mubr.msk.f32.vlgmr.msra.gmra.mrb[8].mxu1 %vm175_vm2, %v876_v33 }
0x1411   :  { %v945_v35 = vpop.f32.mrb[8].mxu1 }
0x1412   :  { %v949_v36 = vadd.f32 %v945_v35, %v168_v34  ;;  %v1267_v37 = vpop.f32.mrb[9].mxu1 }
0x1414   :  { %1399 = vtanh.f32 %v949_v36  ;;  %v1105_v39 = vmul.f32 -1.442695, %v949_v36 }
0x1416   :  { %1401 = vpow2.f32 %v1105_v39 }
0x141e   :  { %v1400_v38 = vpop.eup %1399 }
0x141f   :  { %959 = vrot.lane.b32.xlu0 %v1400_v38, %s1438_s13 }
0x1420   :  { %v1402_v40 = vpop.eup %1401 }
0x1421   :  { %v953_v41 = vadd.f32 1.0, %v1402_v40 }
0x1423   :  { %1403 = vrcp.f32 %v953_v41 }
0x142d   :  { %v1404_v42 = vpop.eup %1403 }
0x142e   :  { %v957_v45 = vmul.f32 %v1404_v42, %v867_v62 }
0x1491   :  { %v960_v43 = vpop.permute.xlu0 %959 }
0x1492   :  { %v962_v44 = vmul.f32 %v1404_v42, %v960_v43 }
0x1494   :  { %964 = vrot.lane.b32.xlu1 %v962_v44, %s1439_s3 }
0x1506   :  { %v965_v46 = vpop.permute.xlu1 %964 }
0x1507   :  { %v967_v13 = vadd.f32 %v965_v46, %v957_v45 }
0x1509   :  { %1405 = vtanh.f32 %v967_v13 }
0x1513   :  { %v1406_v52 = vpop.eup %1405 }
0x1514   :  { %970 = vrot.lane.b32.xlu0 %v1406_v52, %s1438_s13 }
0x1586   :  { %v971_v53 = vpop.permute.xlu0 %970 }
0x1587   :  { %v973_v54 = vmul.f32 %v1404_v42, %v971_v53 }
0x1589   :  { %986 = vrot.lane.b32.xlu1 %v973_v54, %s1439_s3 }
0x15fb   :  { %v987_v55 = vpop.permute.xlu1 %986 }
0x15fc   :  { %1277 = vmatmul.mubr.msk.f32.vlgmr.msra.gmra.mrb[14].mxu0 %vm175_vm2, %v987_v55 }
0x16cf   :  { %v1056_v57 = vpop.f32.mrb[14].mxu0 }
0x16d0   :  { %v1057_v58 = vadd.f32 %v1106_v56, %v1056_v57  ;;  %v1278_v60 = vpop.f32.mrb[15].mxu0 }
0x16d2   :  { %v1108_v63 = vmul.f32 -1.442695, %v1057_v58 }
0x16d4   :  { %1407 = vpow2.f32 %v1108_v63 }
0x16de   :  { %v1408_v3 = vpop.eup %1407 }
0x16df   :  { %v1063_v0 = vadd.f32 1.0, %v1408_v3 }
0x16e1   :  { %1409 = vrcp.f32 %v1063_v0 }
0x16eb   :  { %v1410_v1 = vpop.eup %1409 }
0x16ec   :  { %1067 = vst.msk [vmem:[#allocation2] sm:$0xff] %vm1066_vm3, %v1410_v1 }
0x16ed   :  { %1422 = shalt.err (!%p1419_p4)
}
0x16ee   :  { %s1423_s12 = scalar_lea.hbm %s1681_s6, 128 }
0x16ef   :  { %p1424_p5 = scmp.ne.s32.totalorder %s1681_s6, %s1423_s12  ;;  %p1427_p6 = scmp.lt.u32.totalorder %s1423_s12, %s1681_s6 }
0x16f1   :  { %p1429_p7 = pnand %p1427_p6, %p1424_p5 }
0x16f3   :  { %1432 = shalt.err (!%p1429_p7)
}
0x16f4   :  { %1077 = dma.vmem_to_hbm [thread:$0]  %s1075_s10, 128, %s1681_s6, [#allocation3]  }
0x16f5   :  { %1433 = dma.done.wait [#allocation3], 128  }
0x16f6   :  { %1434 = vsyncadd [#allocation3], 4294967168 }
0x16f7   :  { %1081 = vsyncpa [#allocation3], 1 }

</bundles_post_ra>
